<compile_context>
chip_gen: v7x
topology: tpu7x:2x2x1
jax: 0.10.0
libtpu: 0.0.40
codegen_flags: <defaults>
</compile_context>

<pallas_src>
import functools

import jax
import jax.numpy as jnp
from jax.experimental import pallas as pl
from jax.experimental.pallas import tpu as pltpu


_ALIGN = 8  # sublane-aligned start of the x / W1 section inside the packed slabs


def stacked_classifier_kernel(params_ref, data_ref, out_ref, *, d, e):
    dp1 = d + 1
    # Packed parameter slab:
    #   rows [0, e)              : [W2 | b2]                         (E, D+1)
    #   rows [_ALIGN, _ALIGN+d+1): [[W1, b1], [0 ... 0, 1]]          (D+1, D+1)
    w2a = params_ref[pl.ds(0, e), :]
    w1e = params_ref[pl.ds(_ALIGN, dp1), :]
    # Packed data slab (batch on lanes):
    #   rows [0, e)              : preds^T                           (E, TILE_B)
    #   rows [_ALIGN, _ALIGN+d+1): [x^T ; ones]                      (D+1, TILE_B)
    preds = data_ref[pl.ds(0, e), :]
    x_aug = data_ref[pl.ds(_ALIGN, dp1), :]

    # Layer 1 + ReLU (MXU, f32 accumulation).  Row d of the result equals
    # relu(1) == 1, which carries the layer-2 bias through the next matmul.
    h = jnp.dot(w1e, x_aug, preferred_element_type=jnp.float32)   # (D+1, TILE_B)
    h = jnp.maximum(h, 0.0)

    # Layer 2 -> logits over estimators.  E is the true extent (no zero
    # padding reaches the softmax reductions).
    logits = jnp.dot(w2a, h, preferred_element_type=jnp.float32)  # (E, TILE_B)

    # Numerically-stable softmax over the estimator (sublane) axis.
    m = jnp.max(logits, axis=0, keepdims=True)
    p = jnp.exp(logits - m)
    inv = pl.reciprocal(jnp.sum(p, axis=0, keepdims=True), approx=True)
    weights = p * inv

    # Per-sample weighted sum of estimator predictions -> (1, TILE_B), lane-dense.
    out_ref[...] = jnp.sum(weights * preds, axis=0, keepdims=True)


def stacked_parametric_classifier(x, preds, w1, b1, w2, b2, *, tile_b=256):
    """Batched forward of StackedParametricClassifier.

    x:     (B, D) f32 input samples (PyTorch row layout).
    preds: (B, E) f32 precomputed base-estimator probabilities.
    w1: (D, D), b1: (D,)  -- nn_layer1 weights in PyTorch (out, in) layout.
    w2: (E, D), b2: (E,)  -- nn_layer2 weights in PyTorch (out, in) layout.
    Returns (B,) f32: dot(softmax(W2 relu(W1 x + b1) + b2), preds) per sample.
    """
    B, D = x.shape
    E = w2.shape[0]
    dp1 = D + 1
    rows = _ALIGN + dp1

    # ---- host-side packing (pure layout plumbing) ----
    # One parameter slab, fetched once per call, VMEM-resident across the grid.
    w1_ext = jnp.zeros((dp1, dp1), jnp.float32)
    w1_ext = w1_ext.at[:D, :D].set(w1.astype(jnp.float32))
    w1_ext = w1_ext.at[:D, D].set(b1.astype(jnp.float32))
    w1_ext = w1_ext.at[D, D].set(1.0)
    w2_aug = jnp.concatenate(
        [w2.astype(jnp.float32), b2.astype(jnp.float32)[:, None]], axis=1)
    params = jnp.zeros((rows, dp1), jnp.float32)
    params = params.at[:E, :].set(w2_aug)
    params = params.at[_ALIGN:, :].set(w1_ext)

    # One data slab: batch along the lane axis, padded to a multiple of tile_b.
    bp = ((B + tile_b - 1) // tile_b) * tile_b
    data = jnp.zeros((rows, bp), jnp.float32)
    data = data.at[:E, :B].set(preds.astype(jnp.float32).T)
    data = data.at[_ALIGN:_ALIGN + D, :B].set(x.astype(jnp.float32).T)
    data = data.at[_ALIGN + D, :].set(1.0)          # bias-carrying ones row

    kernel = functools.partial(stacked_classifier_kernel, d=D, e=E)
    out = pl.pallas_call(
        kernel,
        out_shape=jax.ShapeDtypeStruct((1, bp), jnp.float32),
        grid=(bp // tile_b,),
        in_specs=[
            pl.BlockSpec((rows, dp1), lambda i: (0, 0)),      # params: resident
            pl.BlockSpec((rows, tile_b), lambda i: (0, i)),   # data: batch tile
        ],
        out_specs=pl.BlockSpec((1, tile_b), lambda i: (0, i)),
        compiler_params=pltpu.CompilerParams(
            dimension_semantics=("parallel",)),               # v7x dual-TC split
    )(params, data)
    return out[0, :B]


def reference_forward(x, preds, w1, b1, w2, b2):
    h = jnp.maximum(x @ w1.T + b1, 0.0)
    logits = h @ w2.T + b2
    wts = jax.nn.softmax(logits, axis=-1)
    return jnp.sum(wts * preds, axis=-1)


def _torch_linear_init(key, fan_in, shape):
    # Deterministic analogue of nn.Linear default init: U(-1/sqrt(fan_in), +).
    bound = 1.0 / jnp.sqrt(jnp.float32(fan_in))
    return jax.random.uniform(key, shape, jnp.float32, -bound, bound)


if __name__ == "__main__":
    INPUT_DIM = 32       # input_dim
    N_ESTIMATORS = 4     # len(self.estimators)
    BATCH = 512          # batched per perf review; 2 grid tiles of 256 lanes

    key = jax.random.PRNGKey(0)
    kx, kp, k1w, k1b, k2w, k2b = jax.random.split(key, 6)

    x = jax.random.normal(kx, (BATCH, INPUT_DIM), jnp.float32)
    # Precomputed base-estimator probabilities (stand-in for predict_proba).
    preds = jax.random.uniform(kp, (BATCH, N_ESTIMATORS), jnp.float32)

    # nn_layer1 / nn_layer2 in PyTorch (out_features, in_features) layout.
    w1 = _torch_linear_init(k1w, INPUT_DIM, (INPUT_DIM, INPUT_DIM))
    b1 = _torch_linear_init(k1b, INPUT_DIM, (INPUT_DIM,))
    w2 = _torch_linear_init(k2w, INPUT_DIM, (N_ESTIMATORS, INPUT_DIM))
    b2 = _torch_linear_init(k2b, INPUT_DIM, (N_ESTIMATORS,))

    fwd = jax.jit(lambda *a: stacked_parametric_classifier(*a, tile_b=256))
    out = jax.block_until_ready(fwd(x, preds, w1, b1, w2, b2))

    ref = reference_forward(x, preds, w1, b1, w2, b2)
    assert out.shape == (BATCH,)
    # Tolerance relaxed vs 1e-5 because the softmax denominator uses the EUP
    # approximate reciprocal (per perf review) and the MXU f32 matmul path.
    max_err = float(jnp.max(jnp.abs(out - ref)))
    assert jnp.allclose(out, ref, atol=5e-3, rtol=5e-3), max_err

    print("KERNEL_OK")
</pallas_src>

<mosaic_0001>
module attributes {stable_mosaic.version = 11 : i64} {
  func.func @stacked_classifier_kernel(%arg0: i32, %arg1: memref<41x33xf32, #tpu.memory_space<vmem>>, %arg2: memref<41x256xf32, #tpu.memory_space<vmem>>, %arg3: memref<1x256xf32, #tpu.memory_space<vmem>>) attributes {dimension_semantics = [#tpu.dimension_semantics<parallel>], iteration_bounds = array<i64: 2>, scalar_prefetch = 0 : i64, scratch_operands = 0 : i64, tpu.core_type = #tpu.core_type<tc>, window_params = [{pipeline_mode = #tpu.pipeline_mode<synchronous>, transform_indices = @transform_0, window_bounds = array<i64: 41, 33>}, {transform_indices = @transform_1, window_bounds = array<i64: 41, 256>}, {transform_indices = @transform_2, window_bounds = array<i64: 1, 256>}]} {
    %c0 = arith.constant 0 : index
    %c0_0 = arith.constant 0 : index
    %0 = vector.load %arg1[%c0, %c0_0] : memref<41x33xf32, #tpu.memory_space<vmem>>, vector<4x33xf32>
    %c8 = arith.constant 8 : index
    %c0_1 = arith.constant 0 : index
    %1 = vector.load %arg1[%c8, %c0_1] : memref<41x33xf32, #tpu.memory_space<vmem>>, vector<33x33xf32>
    %c0_2 = arith.constant 0 : index
    %c0_3 = arith.constant 0 : index
    %2 = vector.load %arg2[%c0_2, %c0_3] : memref<41x256xf32, #tpu.memory_space<vmem>>, vector<4x256xf32>
    %c8_4 = arith.constant 8 : index
    %c0_5 = arith.constant 0 : index
    %3 = vector.load %arg2[%c8_4, %c0_5] : memref<41x256xf32, #tpu.memory_space<vmem>>, vector<33x256xf32>
    %cst = arith.constant dense<0.000000e+00> : vector<33x256xf32>
    %4 = tpu.matmul %1, %3, %cst {dimension_numbers = #tpu.dot_dimension_numbers<[1], [0], [0], [1], [0, 0, 1, 1], [], []>} : vector<33x33xf32>, vector<33x256xf32>, vector<33x256xf32> -> vector<33x256xf32>
    %cst_6 = arith.constant 0.000000e+00 : f32
    %5 = vector.broadcast %cst_6 : f32 to vector<33x256xf32>
    %6 = arith.maximumf %4, %5 : vector<33x256xf32>
    %cst_7 = arith.constant dense<0.000000e+00> : vector<4x256xf32>
    %7 = tpu.matmul %0, %6, %cst_7 {dimension_numbers = #tpu.dot_dimension_numbers<[1], [0], [0], [1], [0, 0, 1, 1], [], []>} : vector<4x33xf32>, vector<33x256xf32>, vector<4x256xf32> -> vector<4x256xf32>
    %cst_8 = arith.constant dense<0xFF800000> : vector<256xf32>
    %8 = vector.multi_reduction <maximumf>, %7, %cst_8 [0] : vector<4x256xf32> to vector<256xf32>
    %9 = vector.shape_cast %8 : vector<256xf32> to vector<1x256xf32>
    %10 = vector.broadcast %9 : vector<1x256xf32> to vector<4x256xf32>
    %11 = arith.subf %7, %10 : vector<4x256xf32>
    %12 = math.exp %11 : vector<4x256xf32>
    %cst_9 = arith.constant dense<0.000000e+00> : vector<256xf32>
    %13 = vector.multi_reduction <add>, %12, %cst_9 [0] : vector<4x256xf32> to vector<256xf32>
    %14 = vector.shape_cast %13 : vector<256xf32> to vector<1x256xf32>
    %15 = tpu.reciprocal %14 {approx = true} : vector<1x256xf32> -> vector<1x256xf32>
    %16 = vector.broadcast %15 : vector<1x256xf32> to vector<4x256xf32>
    %17 = arith.mulf %12, %16 : vector<4x256xf32>
    %18 = arith.mulf %17, %2 : vector<4x256xf32>
    %cst_10 = arith.constant dense<0.000000e+00> : vector<256xf32>
    %19 = vector.multi_reduction <add>, %18, %cst_10 [0] : vector<4x256xf32> to vector<256xf32>
    %20 = vector.shape_cast %19 : vector<256xf32> to vector<1x256xf32>
    %c0_11 = arith.constant 0 : index
    %c0_12 = arith.constant 0 : index
    %21 = vector.load %arg3[%c0_11, %c0_12] : memref<1x256xf32, #tpu.memory_space<vmem>>, vector<1x256xf32>
    tpu.vector_store %arg3[%c0_11, %c0_12], %20 {strides = array<i32>} : memref<1x256xf32, #tpu.memory_space<vmem>>, vector<1x256xf32>,
    return
  }
  func.func @transform_0(%arg0: i32) -> (i32, i32) {
    %c0_i32 = arith.constant 0 : i32
    %c0_i32_0 = arith.constant 0 : i32
    %c0_i32_1 = arith.constant 0 : i32
    return %c0_i32, %c0_i32_0 : i32, i32
  }
  func.func @transform_1(%arg0: i32) -> (i32, i32) {
    %c0_i32 = arith.constant 0 : i32
    %c0_i32_0 = arith.constant 0 : i32
    return %c0_i32, %arg0 : i32, i32
  }
  func.func @transform_2(%arg0: i32) -> (i32, i32) {
    %c0_i32 = arith.constant 0 : i32
    %c0_i32_0 = arith.constant 0 : i32
    return %c0_i32, %arg0 : i32, i32
  }
}

</mosaic_0001>

<bundles_post_ra>
// kernel: _lambda_.1
= control target key start
LH: loop header
LB: loop body
LE: loop exit
PB: predicated region body
PF: predicated region fallthrough
CT: control target
= control target key end

     0   :  { %7 = vsyncpa [#allocation4], 0  ;;  %s901_s0 = inlined_call_operand.vmem [shape: f32[41,33], index: 0, kind: input, shape index: {}]   ;;  %s902_s1 = inlined_call_operand.vmem [shape: f32[41,512], index: 1, kind: input, shape index: {}]   ;;  %s903_s2 = inlined_call_operand.hbm [shape: f32[1,512], index: 2, kind: output, shape index: {}]  }
   0x1   :  { %9 = vsyncpa [#allocation4 + $0x1], 0  ;;  %s743_s9 = smov 0   ;;  %s745_s10 = smov 0  }
   0x2   :  { %s747_s11 = smov 0   ;;  %s749_s12 = smov 0  }
   0x3 LB: > { %s569_s13 = sadd.s32 4294967295, %s723_s12   ;;  %s570_s14 = sadd.s32 4294967294, %s723_s12   ;;  %s723_s12 = sphi %s749_s12, %s909_s12   ;;  %s719_s11 = sphi %s747_s11, %s908_s11   ;;  %s715_s10 = sphi %s745_s10, %s907_s10   ;;  %s711_s9 = sphi %s743_s9, %s906_s9  }
   0x4   : > { %s766_s15 = sadd.s32 1, %s723_s12   ;;  %s43_s16 = sadd.s32 1, %s719_s11 }
   0x5   : > { %s40_s17 = ssub.s32 %s723_s12, %s766_s15  ;;  %p50_p0 = scmp.ne.s32.totalorder %s719_s11, %s715_s10 }
   0x6   : > { %p41_p1 = scmp.eq.s32.totalorder %s40_s17, 0  ;;  %p51_p2 = scmp.eq.s32.totalorder %s723_s12, 0 }
   0x7   : > { %p80_p3 = scmp.eq.s32.totalorder %s569_s13, 1  ;;  %p85_p4 = scmp.ne.s32.totalorder %s715_s10, %s711_s9 }
   0x8   : > { %s779_s18 = scalar_select %p41_p1, %s719_s11, %s43_s16  }
   0x9   : > { %p52_p5 = por %p51_p2, %p50_p0  ;;  %p781_p6 = por %p80_p3, %p50_p0 }
   0xa   : > { %p86_p7 = scmp.eq.s32.totalorder %s570_s14, 1  ;;  %p572_p9 = scmp.ge.s32.totalorder %s723_s12, 2 }
   0xc   : > { %p785_p8 = por %p86_p7, %p85_p4  ;;  %105 = sbr.rel (%p572_p9) target bundleno = 29 (0x1d), region = 20 }
  0x13   : > { %108 = sbr.rel (!%p52_p5) target bundleno = 29 (0x1d), region = 24  ;;  %s110_s21 = sand.u32 (%p52_p5), 1, %s719_s11  }
  0x14   : > { %s592_s22 = sshll.u32 (%p52_p5), %s723_s12, 4  ;;  %s610_s23 = smul.u32 (%p52_p5), 96, %s110_s21 }
  0x15   : > { %s115_s26 = scalar_lea.vmem (%p52_p5), %s902_s1, %s592_s22 }
  0x16   : > { %v128_v0 = vld [vmem:[%s115_s26] sm:$0xff] (%p52_p5)  ;;  %v130_v1 = vld [vmem:[%s115_s26 + $0x8] sm:$0xff] (%p52_p5)  ;;  %s112_s27 = scalar_lea.vmem (%p52_p5), [#allocation2], %s610_s23 }
  0x17   : > { %v132_v2 = vld [vmem:[%s115_s26 + $0x20] sm:$0xff] (%p52_p5)  ;;  %v134_v3 = vld [vmem:[%s115_s26 + $0x28] sm:$0xff] (%p52_p5)  ;;  %129 = vst [vmem:[%s112_s27] sm:$0xff] (%p52_p5), %v128_v0  ;;  %131 = vst [vmem:[%s112_s27 + $0x8] sm:$0xff] (%p52_p5), %v130_v1 }
  0x18   : > { %v136_v4 = vld [vmem:[%s115_s26 + $0x40] sm:$0xff] (%p52_p5)  ;;  %v138_v5 = vld [vmem:[%s115_s26 + $0x48] sm:$0xff] (%p52_p5)  ;;  %133 = vst [vmem:[%s112_s27 + $0x10] sm:$0xff] (%p52_p5), %v132_v2  ;;  %135 = vst [vmem:[%s112_s27 + $0x18] sm:$0xff] (%p52_p5), %v134_v3 }
  0x19   : > { %137 = vst [vmem:[%s112_s27 + $0x20] sm:$0xff] (%p52_p5), %v136_v4  ;;  %139 = vst [vmem:[%s112_s27 + $0x28] sm:$0xff] (%p52_p5), %v138_v5  ;;  %v140_v6 = vld [vmem:[%s115_s26 + $0x60] sm:$0xff] (%p52_p5)  ;;  %v142_v7 = vld [vmem:[%s115_s26 + $0x68] sm:$0xff] (%p52_p5) }
  0x1a   : > { %v144_v8 = vld [vmem:[%s115_s26 + $0x80] sm:$0xff]  ;;  %141 = vst [vmem:[%s112_s27 + $0x30] sm:$0xff] %v140_v6  ;;  %143 = vst [vmem:[%s112_s27 + $0x38] sm:$0xff] %v142_v7  ;;  %v146_v9 = vld [vmem:[%s115_s26 + $0x88] sm:$0xff] }
  0x1b   : > { %145 = vst [vmem:[%s112_s27 + $0x40] sm:$0xff] %v144_v8  ;;  %v148_v10 = vld [vmem:[%s115_s26 + $0xa0] sm:$0xff]  ;;  %v150_v11 = vld [vmem:[%s115_s26 + $0xa8] sm:$0xff]  ;;  %147 = vst [vmem:[%s112_s27 + $0x48] sm:$0xff] %v146_v9 }
  0x1c   : > { %149 = vst [vmem:[%s112_s27 + $0x50] sm:$0xff] %v148_v10  ;;  %151 = vst [vmem:[%s112_s27 + $0x58] sm:$0xff] %v150_v11 }
  0x1d PF: > { %p575_p10 = scmp.ge.s32.totalorder %s723_s12, 1  ;;  %p156_p11 = scmp.lt.s32.totalorder %s723_s12, 3 }
  0x1f   : > { %p157_p12 = pnand %p575_p10, %p156_p11 }
  0x20   : > { %s800_s28 = sand.u32 (!%p157_p12), 1, %s715_s10   ;;  %v725_v12 = vmov (!%p157_p12), 0.0   ;;  %vm220_vm0 = vcmask (!%p157_p12), 1040384   ;;  %v187_v27 = vld [vmem:[%s901_s0 + $0x8] sm:$0xff] (!%p157_p12)  ;;  %vm204_vm1 = vcmask (!%p157_p12), 269312   ;;  %v188_v28 = vld [vmem:[%s901_s0 + $0x10] sm:$0xff] (!%p157_p12) }
  0x21   : > { %160 = sbr.rel (%p157_p12) target bundleno = 587 (0x24b), region = 47  ;;  %291 = vmatprep.mubr.f32.mxu0 (!%p157_p12), %v725_v12  ;;  %405 = vmatprep.mubr.f32.mxu1 (!%p157_p12), %v725_v12  ;;  %v189_v29 = vld [vmem:[%s901_s0 + $0x18] sm:$0xff] (!%p157_p12)  ;;  %v190_v30 = vld [vmem:[%s901_s0 + $0x20] sm:$0xff] (!%p157_p12)  ;;  %v191_v31 = vld [vmem:[%s901_s0 + $0x28] sm:$0x1] (!%p157_p12)  ;;  %vm412_vm2 = vcmask (!%p157_p12), 1043456  }
  0x22   : > { %s611_s29 = smul.u32 (!%p157_p12), 96, %s800_s28  ;;  %v186_v56 = vld [vmem:[%s901_s0] sm:$0xf] (!%p157_p12)  ;;  %s576_s24 = sshll.u32 (!%p157_p12), %s800_s28, 1 }
  0x23   : > { %s593_s25 = sshll.u32 (!%p157_p12), %s569_s13, 5  ;;  %s183_s26 = scalar_lea.vmem (!%p157_p12), [#allocation3], %s576_s24 }
  0x24   : > { %s803_s30 = scalar_lea.vmem (!%p157_p12), [#allocation2], %s611_s29  ;;  %s505_s27 = sshll.u32 (!%p157_p12), %s183_s26, 4  ;;  %s859_s27 = int_to_ptr.vmem [resolvable:$true] %s505_s27 }
  0x25   : > { %v195_v13 = vld [vmem:[%s803_s30 + $0x18] sm:$0xff] (!%p157_p12)  ;;  %v197_v14 = vld [vmem:[%s803_s30 + $0x28] sm:$0xff] (!%p157_p12)  ;;  %v194_v15 = vld [vmem:[%s803_s30 + $0x10] sm:$0xff] (!%p157_p12)  ;;  %s857_s3 = scalar_lea.hbm (!%p157_p12), %s903_s2, %s593_s25  ;;  %s491_s4 = scalar_lea.sflag (!%p157_p12), [#allocation4], %s800_s28 }
  0x26   : > { %v594_v16 = vpack.c.bf16 (!%p157_p12), %v197_v14, %v195_v13  ;;  %v196_v17 = vld [vmem:[%s803_s30 + $0x20] sm:$0xff] (!%p157_p12)  ;;  %v199_v18 = vld [vmem:[%s803_s30 + $0x38] sm:$0xff] (!%p157_p12)  ;;  %v201_v19 = vld [vmem:[%s803_s30 + $0x48] sm:$0xff] (!%p157_p12)  ;;  %s661_s5 = scalar_lea.vmem (!%p157_p12), %s859_s27, 32  ;;  %s727_s13 = smov (!%p157_p12), [#allocation3]  }
  0x27   : > { %v596_v20 = vpack.c.bf16 (!%p157_p12), %v196_v17, %v194_v15  ;;  %v598_v21 = vpack.c.bf16 (!%p157_p12), %v201_v19, %v199_v18  ;;  %v198_v22 = vld [vmem:[%s803_s30 + $0x30] sm:$0xff] (!%p157_p12)  ;;  %v200_v23 = vld [vmem:[%s803_s30 + $0x40] sm:$0xff] (!%p157_p12)  ;;  %v203_v25 = vld [vmem:[%s803_s30 + $0x58] sm:$0x1] (!%p157_p12)  ;;  %p662_p13 = scmp.ne.s32.totalorder (!%p157_p12), %s859_s27, %s661_s5  ;;  %s665_s6 = sshll.u32 (!%p157_p12), %s727_s13, 4  ;;  %s666_s6 = int_to_ptr.vmem [resolvable:$false] %s665_s6 }
  0x28   : > { %595 = vmatprep.subr.bf16.mxu0 %v594_v16  ;;  %v600_v24 = vpack.c.bf16 %v200_v23, %v198_v22  ;;  %v202_v26 = vld [vmem:[%s803_s30 + $0x50] sm:$0x1]  ;;  %s667_s7 = scalar_lea.vmem %s666_s6, 64  ;;  %p668_p2 = scmp.lt.s32.totalorder %s859_s27, %s666_s6 }
  0x29   : > { %597 = vmatpush1.bf16.msra.mxu0 %v596_v20  ;;  %p663_p0 = pnand %p662_p13, %p781_p6  ;;  %p669_p3 = scmp.lt.s32.totalorder %s667_s7, %s661_s5 }
  0x2a   : > { %599 = vmatprep.subr.bf16.mxu0 %v598_v21 }
  0x2b   : > { %p664_p1 = pneg %p663_p0  ;;  %p670_p4 = por %p669_p3, %p668_p2 }
  0x2d   : > { %601 = vmatpush1.bf16.msra.mxu0 %v600_v24  ;;  %p671_p5 = pnand %p670_p4, %p664_p1 }
  0x2e   : > { %577 = vmatprep.subr.msk.mxu0 %vm220_vm0, %v203_v25 }
  0x31   : > { %578 = vmatpush1.msk.msra.mxu0 %vm220_vm0, %v202_v26 }
  0x32   : > { %579 = vmatmul.mubr.msk.f32.vlgmr.msra.gmra.mrb[0].mxu0 %vm204_vm1, %v187_v27 }
  0x33   : > { %297 = vmatprep.mubr.f32.mxu0 %v725_v12 }
  0x36   : > { %580 = vmatmul.mubr.msk.f32.gmra.mrb[2].mxu0 %vm204_vm1, %v188_v28 }
  0x37   : > { %303 = vmatprep.mubr.f32.mxu0 %v725_v12 }
  0x3a   : > { %581 = vmatmul.mubr.msk.f32.gmra.mrb[4].mxu0 %vm204_vm1, %v189_v29 }
  0x3b   : > { %309 = vmatprep.mubr.f32.mxu0 %v725_v12 }
  0x3e   : > { %582 = vmatmul.mubr.msk.f32.gmra.mrb[6].mxu0 %vm204_vm1, %v190_v30  ;;  %v192_v30 = vld [vmem:[%s803_s30] sm:$0xf] }
  0x3f   : > { %315 = vmatprep.mubr.f32.mxu0 %v725_v12 }
  0x42   : > { %583 = vmatmul.mubr.msk.f32.gmra.mrb[8].mxu0 %vm204_vm1, %v191_v31 }
 0x105   : > { %v293_v32 = vpop.f32.mrb[0].mxu0 }
 0x106   : > { %v295_v33 = vpop.f32.mrb[1].mxu0  ;;  %v322_v35 = vmax.f32 %v293_v32, 0.0 }
 0x107   : > { %v323_v38 = vmax.f32 %v295_v33, 0.0  ;;  %v193_v33 = vld [vmem:[%s803_s30 + $0x8] sm:$0xf] }
 0x109   : > { %v299_v34 = vpop.f32.mrb[2].mxu0 }
 0x10a   : > { %v324_v36 = vmax.f32 %v299_v34, 0.0  ;;  %v301_v37 = vpop.f32.mrb[3].mxu0 }
 0x10b   : > { %v325_v39 = vmax.f32 %v301_v37, 0.0 }
 0x10c   : > { %v604_v40 = vpack.c.bf16 %v324_v36, %v322_v35 }
 0x10d   : > { %v305_v41 = vpop.f32.mrb[4].mxu0  ;;  %v602_v42 = vpack.c.bf16 %v325_v39, %v323_v38 }
 0x10e   : > { %v307_v43 = vpop.f32.mrb[5].mxu0  ;;  %v326_v45 = vmax.f32 %v305_v41, 0.0 }
 0x10f   : > { %603 = vmatprep.subr.bf16.mxu1 %v602_v42  ;;  %v327_v48 = vmax.f32 %v307_v43, 0.0  ;;  %v726_v43 = vmov 1966171168  }
 0x110   : > { %605 = vmatpush1.bf16.msra.mxu1 %v604_v40 }
 0x111   : > { %v311_v44 = vpop.f32.mrb[6].mxu0 }
 0x112   : > { %v328_v46 = vmax.f32 %v311_v44, 0.0  ;;  %v313_v47 = vpop.f32.mrb[7].mxu0  ;;  %v471_v44 = vunpack.c.l.s4 %v726_v43 }
 0x113   : > { %v329_v49 = vmax.f32 %v313_v47, 0.0 }
 0x114   : > { %v608_v50 = vpack.c.bf16 %v328_v46, %v326_v45  ;;  %v473_v45 = vlaneseq }
 0x115   : > { %v606_v51 = vpack.c.bf16 %v329_v49, %v327_v48  ;;  %v317_v52 = vpop.f32.mrb[8].mxu0 }
 0x116   : > { %v319_v53 = vpop.f32.mrb[9].mxu0  ;;  %v330_v55 = vmax.f32 %v317_v52, 0.0  ;;  %vm487_vm3 = vcmp.lt.s32.totalorder %v473_v45, 256 }
 0x117   : > { %v331_v54 = vmax.f32 %v319_v53, 0.0  ;;  %607 = vmatprep.subr.bf16.mxu1 %v606_v51  ;;  %v474_v51 = vshrl.u32 %v473_v45, 7 }
 0x118   : > { %609 = vmatpush1.bf16.msra.mxu1 %v608_v50  ;;  %v472_v50 = vunpack.c.0.s8 %v471_v44 }
 0x119   : > { %584 = vmatprep.subr.msk.mxu1 %vm220_vm0, %v331_v54 }
 0x11c   : > { %585 = vmatpush1.msk.msra.mxu1 %vm220_vm0, %v330_v55 }
 0x11d   : > { %586 = vmatmul.mubr.msk.f32.vlgmr.msra.gmra.mrb[0].mxu1 %vm204_vm1, %v186_v56  ;;  %v475_v56 = vsub.s32 %v472_v50, %v474_v51 }
 0x1f0   : > { %v407_v57 = vpop.f32.mrb[0].mxu1 }
 0x1f1   : > { %v413_v58 = vsel %vm412_vm2, %v407_v57, -inf  ;;  %v409_v59 = vpop.f32.mrb[1].mxu1 }
 0x1f2   : > { %v414_v60 = vrot.slane %v413_v58, 4  ;;  %v420_v61 = vsel %vm412_vm2, %v409_v59, -inf }
 0x1f3   : > { %v421_v62 = vrot.slane %v420_v61, 4 }
 0x1f4   : > { %v415_v63 = vmax.f32 %v413_v58, %v414_v60 }
 0x1f5   : > { %v422_v0 = vmax.f32 %v420_v61, %v421_v62 }
 0x1f6   : > { %v416_v1 = vrot.slane %v415_v63, 2 }
 0x1f7   : > { %v423_v2 = vrot.slane %v422_v0, 2 }
 0x1f8   : > { %v417_v3 = vmax.f32 %v415_v63, %v416_v1 }
 0x1f9   : > { %v424_v4 = vmax.f32 %v422_v0, %v423_v2 }
 0x1fa   : > { %v418_v5 = vrot.slane %v417_v3, 1 }
 0x1fb   : > { %v425_v6 = vrot.slane %v424_v4, 1 }
 0x1fc   : > { %v419_v7 = vmax.f32 %v417_v3, %v418_v5 }
 0x1fd   : > { %v426_v8 = vmax.f32 %v424_v4, %v425_v6 }
 0x1fe   : > { %v427_v9 = vsub.f32 %v407_v57, %v419_v7 }
 0x1ff   : > { %v428_v10 = vsub.f32 %v409_v59, %v426_v8 }
 0x200   : > { %v429_v11 = vmul.f32 1.442695, %v427_v9 }
 0x201   : > { %v431_v12 = vmul.f32 1.442695, %v428_v10 }
 0x202   : > { %653 = vpow2.f32 %v429_v11 }
 0x203   : > { %655 = vpow2.f32 %v431_v12 }
 0x20c   : > { %v654_v13 = vpop.eup %653 }
 0x20d   : > { %v656_v14 = vpop.eup %655  ;;  %v433_v15 = vsel %vm412_vm2, %v654_v13, 0.0 }
 0x20e   : > { %v434_v16 = vrot.slane %v433_v15, 4  ;;  %v440_v17 = vsel %vm412_vm2, %v656_v14, 0.0 }
 0x20f   : > { %v441_v18 = vrot.slane %v440_v17, 4 }
 0x210   : > { %v435_v19 = vadd.f32 %v434_v16, %v433_v15 }
 0x211   : > { %v442_v20 = vadd.f32 %v441_v18, %v440_v17 }
 0x212   : > { %v436_v21 = vrot.slane %v435_v19, 2 }
 0x213   : > { %v443_v22 = vrot.slane %v442_v20, 2 }
 0x214   : > { %v437_v23 = vadd.f32 %v436_v21, %v435_v19 }
 0x215   : > { %v444_v24 = vadd.f32 %v443_v22, %v442_v20 }
 0x216   : > { %v438_v25 = vrot.slane %v437_v23, 1 }
 0x217   : > { %v445_v26 = vrot.slane %v444_v24, 1 }
 0x218   : > { %v439_v27 = vadd.f32 %v438_v25, %v437_v23 }
 0x219   : > { %v446_v28 = vadd.f32 %v445_v26, %v444_v24 }
 0x21a   : > { %657 = vrcp.f32 %v439_v27 }
 0x21b   : > { %659 = vrcp.f32 %v446_v28 }
 0x224   : > { %v658_v29 = vpop.eup %657 }
 0x225   : > { %v660_v31 = vpop.eup %659  ;;  %v449_v32 = vmul.f32 %v658_v29, %v654_v13 }
 0x226   : > { %v450_v34 = vmul.f32 %v660_v31, %v656_v14 }
 0x227   : > { %v451_v35 = vmul.f32 %v449_v32, %v192_v30 }
 0x228   : > { %v452_v36 = vmul.f32 %v450_v34, %v193_v33 }
 0x229   : > { %v453_v37 = vsel %vm412_vm2, %v451_v35, 0.0 }
 0x22a   : > { %v454_v38 = vrot.slane %v453_v37, 4  ;;  %v460_v39 = vsel %vm412_vm2, %v452_v36, 0.0 }
 0x22b   : > { %v461_v40 = vrot.slane %v460_v39, 4 }
 0x22c   : > { %v455_v41 = vadd.f32 %v454_v38, %v453_v37 }
 0x22d   : > { %v462_v42 = vadd.f32 %v461_v40, %v460_v39 }
 0x22e   : > { %v456_v46 = vrot.slane %v455_v41, 2 }
 0x22f   : > { %v463_v47 = vrot.slane %v462_v42, 2 }
 0x230   : > { %v457_v48 = vadd.f32 %v456_v46, %v455_v41 }
 0x231   : > { %v464_v49 = vadd.f32 %v463_v47, %v462_v42 }
 0x232   : > { %v458_v52 = vrot.slane %v457_v48, 1 }
 0x233   : > { %v465_v53 = vrot.slane %v464_v49, 1 }
 0x234   : > { %v459_v54 = vadd.f32 %v458_v52, %v457_v48 }
 0x235   : > { %v466_v55 = vadd.f32 %v465_v53, %v464_v49 }
 0x237   : > { %v469_v57 = vcombine.low %v459_v54, %v466_v55 }
 0x239   : > { %v476_v58 = vrot.slane %v469_v57, %v475_v56 }
 0x23b   : > { %v483_v59 = vrot.slane %v476_v58, %v475_v56 }
 0x23d   : > { %489 = vst.msk [vmem:[%s183_s26] sm:$0x3] %vm487_vm3, %v483_v59 }
 0x23e   : > { %674 = shalt.err (!%p671_p5)
}
 0x23f   : > { %s675_s28 = scalar_lea.hbm %s857_s3, 32  ;;  %s679_s16 = scalar_lea.hbm %s903_s2, 64 }
 0x240   : > { %p676_p7 = scmp.ne.s32.totalorder %s857_s3, %s675_s28  ;;  %p680_p12 = scmp.lt.u32.totalorder %s857_s3, %s903_s2 }
 0x241   : > { %p681_p13 = scmp.lt.u32.totalorder %s679_s16, %s675_s28  ;;  %p683_p1 = scmp.lt.u32.totalorder %s675_s28, %s857_s3 }
 0x242   : > { %p677_p10 = pnand %p676_p7, %p781_p6 }
 0x243   : > { %p682_p0 = por %p681_p13, %p680_p12 }
 0x244   : > { %p678_p11 = pneg %p677_p10 }
 0x245   : > { %p684_p2 = por %p683_p1, %p682_p0 }
 0x247   : > { %p685_p3 = pnand %p684_p2, %p678_p11 }
 0x249   : > { %688 = shalt.err (!%p685_p3)
}
 0x24a   : > { %612 = dma.vmem_to_hbm [thread:$0]  (%p781_p6), %s859_s27, 32, %s857_s3, %s491_s4  }
 0x24b PF: > { %s517_s22 = sand.u32 1, %s711_s9   ;;  %p615_p4 = pnand %p572_p9, %p785_p8 }
 0x24c   : > { %s518_s23 = scalar_lea.sflag [#allocation4], %s517_s22 }
 0x24d   : > { %706 = dma.done.wait (!%p615_p4), %s518_s23, 32  }
 0x24e   : > { %708 = vsyncadd (!%p615_p4), %s518_s23, 4294967264  ;;  %p12_p5 = scmp.ge.s32.totalorder %s766_s15, 4   ;;  %s906_s9 = smov %s715_s10 }
 0x24f   : > { %s907_s10 = smov %s719_s11  ;;  %s908_s11 = smov %s779_s18 }
 0x250   : > { %s909_s12 = smov %s766_s15  ;;  %14 = sbr.rel (!%p12_p5) target bundleno = 3 (0x3), region = 91 }
 0x257   :  { %523 = vsyncpa [#allocation4], 1 }
 0x258   :  { %525 = vsyncpa [#allocation4 + $0x1], 1 }

</bundles_post_ra>
